<compile_context>
chip_gen: v6e
topology: v6e:2x2x1
jax: 0.10.0
libtpu: 0.0.40
codegen_flags: <defaults>
</compile_context>

<pallas_src>
import jax
import jax.numpy as jnp
from jax.experimental import pallas as pl
from jax.experimental.pallas import tpu as pltpu


_VMEM_BLOCK_BUDGET = 8 * 1024 * 1024  # bytes for one (single-buffered) block set


def _pick_row_tile(num_rows: int, per_row_bytes: int) -> int:
    """Largest row tile whose double-buffered footprint stays in budget."""
    max_rows = max(8, _VMEM_BLOCK_BUDGET // max(per_row_bytes, 1))
    if num_rows <= max_rows:
        return num_rows                       # one full-extent block along rows
    return max(8, (max_rows // 8) * 8)        # sublane-dense tile; tail is masked


class BackgroundSnapshotter:
    """Update a kernel with a new piece of streaming data (Pallas TPU)."""

    def __init__(self, psd_length, kernel_length, fduration, sample_rate,
                 inference_sampling_rate):
        state_length = kernel_length + fduration + psd_length
        state_length -= 1 / inference_sampling_rate
        self.state_size = int(state_length * sample_rate)

    def __call__(self, update, snapshot):
        assert update.ndim == 3 and snapshot.ndim == 3
        B, C, U = update.shape
        Bs, Cs, S = snapshot.shape
        assert (B, C) == (Bs, Cs), "batch/channel dims must match"

        T = S + U
        # torch's x[:, :, -state_size:] clamps when state_size > T; -0: == full.
        eff_state = T if self.state_size == 0 else min(self.state_size, T)
        offset = T - eff_state                       # static Python int
        dtype = jnp.result_type(snapshot.dtype, update.dtype)

        # Degenerate sizes would create zero-sized block dims -> plain JAX.
        if B * C == 0 or S == 0 or U == 0 or eff_state == 0:
            x = jnp.concatenate(
                [snapshot.astype(dtype), update.astype(dtype)], axis=-1)
            return x, x[:, :, offset:]

        # Flatten (B, C) into one sublane-dense row axis (free reshape).
        R = B * C
        snap2 = snapshot.reshape(R, S)
        upd2 = update.reshape(R, U)

        itemsize = jnp.dtype(dtype).itemsize
        per_row_bytes = itemsize * (S + U + T + eff_state)
        rt = _pick_row_tile(R, per_row_bytes)
        grid = (pl.cdiv(R, rt),)

        def kernel(snap_ref, upd_ref, x_ref, new_ref):
            s = snap_ref[...].astype(dtype)          # (rt, S)
            u = upd_ref[...].astype(dtype)           # (rt, U)
            # x = concat([snapshot, update]) as two direct stores; the snapshot
            # half stays lane-aligned, no concatenated temporary is built.
            x_ref[:, :S] = s
            x_ref[:, S:] = u
            # New snapshot = trailing eff_state samples (static branching).
            if offset == 0:
                new_ref[:, :S] = s
                new_ref[:, S:] = u
            elif offset >= S:
                new_ref[...] = u[:, offset - S:]
            else:
                new_ref[:, :S - offset] = s[:, offset:]
                new_ref[:, S - offset:] = u

        # Steady state: new snapshot matches old snapshot shape/dtype -> alias
        # so a donating caller reuses the ring-buffer HBM allocation.
        aliases = {}
        if eff_state == S and snap2.dtype == dtype:
            aliases = {0: 1}   # snapshot input -> new-snapshot output

        bytes_accessed = (snap2.size * snap2.dtype.itemsize
                          + upd2.size * upd2.dtype.itemsize
                          + R * (T + eff_state) * itemsize)

        x2, new2 = pl.pallas_call(
            kernel,
            out_shape=(
                jax.ShapeDtypeStruct((R, T), dtype),
                jax.ShapeDtypeStruct((R, eff_state), dtype),
            ),
            grid=grid,
            in_specs=[
                pl.BlockSpec((rt, S), lambda r: (r, 0)),
                pl.BlockSpec((rt, U), lambda r: (r, 0)),
            ],
            out_specs=(
                pl.BlockSpec((rt, T), lambda r: (r, 0)),
                pl.BlockSpec((rt, eff_state), lambda r: (r, 0)),
            ),
            input_output_aliases=aliases,
            compiler_params=pltpu.CompilerParams(
                dimension_semantics=("parallel",)),
            cost_estimate=pl.CostEstimate(
                flops=0, transcendentals=0,
                bytes_accessed=int(bytes_accessed)),
        )(snap2, upd2)

        return x2.reshape(B, C, T), new2.reshape(B, C, eff_state)


if __name__ == "__main__":
    key = jax.random.PRNGKey(0)

    # Small-but-consistent streaming config.
    psd_length = 8.0
    kernel_length = 2.0
    fduration = 1.0
    sample_rate = 32.0
    inference_sampling_rate = 4.0

    snapshotter = BackgroundSnapshotter(
        psd_length, kernel_length, fduration, sample_rate,
        inference_sampling_rate)
    # state_size = int((2 + 1 + 8 - 0.25) * 32) = 344

    B, C = 2, 2
    update_size = int(4 * sample_rate / inference_sampling_rate)    # 32
    k1, k2 = jax.random.split(key)
    snapshot = jax.random.normal(
        k1, (B, C, snapshotter.state_size), dtype=jnp.float32)
    update = jax.random.normal(k2, (B, C, update_size), dtype=jnp.float32)

    # Plain-JAX reference of the forward semantics (computed up front so the
    # check is independent of any buffer aliasing by the kernel).
    x_ref = jnp.concatenate([snapshot, update], axis=-1)
    snap_ref = x_ref[:, :, -snapshotter.state_size:]
    jax.block_until_ready((x_ref, snap_ref))

    x, new_snapshot = snapshotter(update, snapshot)
    jax.block_until_ready((x, new_snapshot))

    assert x.shape == x_ref.shape and x.dtype == x_ref.dtype
    assert new_snapshot.shape == snap_ref.shape
    assert jnp.array_equal(x, x_ref)
    assert jnp.array_equal(new_snapshot, snap_ref)

    print("KERNEL_OK")
</pallas_src>

<mosaic_0001>
module attributes {stable_mosaic.version = 11 : i64} {
  func.func @kernel(%arg0: i32, %arg1: memref<4x344xf32, #tpu.memory_space<vmem>>, %arg2: memref<4x32xf32, #tpu.memory_space<vmem>>, %arg3: memref<4x376xf32, #tpu.memory_space<vmem>>, %arg4: memref<4x344xf32, #tpu.memory_space<vmem>>) attributes {dimension_semantics = [#tpu.dimension_semantics<parallel>], iteration_bounds = array<i64: 1>, scalar_prefetch = 0 : i64, scratch_operands = 0 : i64, tpu.core_type = #tpu.core_type<tc>, window_params = [{transform_indices = @transform_0, window_bounds = array<i64: 4, 344>}, {transform_indices = @transform_1, window_bounds = array<i64: 4, 32>}, {transform_indices = @transform_2, window_bounds = array<i64: 4, 376>}, {transform_indices = @transform_3, window_bounds = array<i64: 4, 344>}]} {
    %c0 = arith.constant 0 : index
    %c0_0 = arith.constant 0 : index
    %0 = vector.load %arg1[%c0, %c0_0] : memref<4x344xf32, #tpu.memory_space<vmem>>, vector<4x344xf32>
    %c0_1 = arith.constant 0 : index
    %c0_2 = arith.constant 0 : index
    %1 = vector.load %arg2[%c0_1, %c0_2] : memref<4x32xf32, #tpu.memory_space<vmem>>, vector<4x32xf32>
    %c0_3 = arith.constant 0 : index
    %c0_4 = arith.constant 0 : index
    %2 = vector.load %arg3[%c0_3, %c0_4] : memref<4x376xf32, #tpu.memory_space<vmem>>, vector<4x344xf32>
    tpu.vector_store %arg3[%c0_3, %c0_4], %0 {strides = array<i32>} : memref<4x376xf32, #tpu.memory_space<vmem>>, vector<4x344xf32>,
    %c0_5 = arith.constant 0 : index
    %c344 = arith.constant 344 : index
    %3 = vector.load %arg3[%c0_5, %c344] : memref<4x376xf32, #tpu.memory_space<vmem>>, vector<4x32xf32>
    tpu.vector_store %arg3[%c0_5, %c344], %1 {strides = array<i32>} : memref<4x376xf32, #tpu.memory_space<vmem>>, vector<4x32xf32>,
    %4 = vector.extract_strided_slice %0 {offsets = [0, 32], sizes = [4, 312], strides = [1, 1]} : vector<4x344xf32> to vector<4x312xf32>
    %c0_6 = arith.constant 0 : index
    %c0_7 = arith.constant 0 : index
    %5 = vector.load %arg4[%c0_6, %c0_7] : memref<4x344xf32, #tpu.memory_space<vmem>>, vector<4x312xf32>
    tpu.vector_store %arg4[%c0_6, %c0_7], %4 {strides = array<i32>} : memref<4x344xf32, #tpu.memory_space<vmem>>, vector<4x312xf32>,
    %c0_8 = arith.constant 0 : index
    %c312 = arith.constant 312 : index
    %6 = vector.load %arg4[%c0_8, %c312] : memref<4x344xf32, #tpu.memory_space<vmem>>, vector<4x32xf32>
    tpu.vector_store %arg4[%c0_8, %c312], %1 {strides = array<i32>} : memref<4x344xf32, #tpu.memory_space<vmem>>, vector<4x32xf32>,
    return
  }
  func.func @transform_0(%arg0: i32) -> (i32, i32) {
    %c0_i32 = arith.constant 0 : i32
    %c0_i32_0 = arith.constant 0 : i32
    return %arg0, %c0_i32 : i32, i32
  }
  func.func @transform_1(%arg0: i32) -> (i32, i32) {
    %c0_i32 = arith.constant 0 : i32
    %c0_i32_0 = arith.constant 0 : i32
    return %arg0, %c0_i32 : i32, i32
  }
  func.func @transform_2(%arg0: i32) -> (i32, i32) {
    %c0_i32 = arith.constant 0 : i32
    %c0_i32_0 = arith.constant 0 : i32
    return %arg0, %c0_i32 : i32, i32
  }
  func.func @transform_3(%arg0: i32) -> (i32, i32) {
    %c0_i32 = arith.constant 0 : i32
    %c0_i32_0 = arith.constant 0 : i32
    return %arg0, %c0_i32 : i32, i32
  }
}

</mosaic_0001>

<bundles_post_ra>
// kernel: tpu_custom_call.1
= control target key start
LH: loop header
LB: loop body
LE: loop exit
PB: predicated region body
PF: predicated region fallthrough
CT: control target
= control target key end

     0   :  { %9 = vsyncpa [#allocation3], 0  ;;  %s201_s0 = inlined_call_operand.hbm [shape: f32[4,344], index: 0, kind: input, shape index: {}, may-alias: {0,3}]   ;;  %s202_s1 = inlined_call_operand.vmem [shape: f32[4,32], index: 1, kind: input, shape index: {}]   ;;  %s203_s2 = inlined_call_operand.hbm [shape: f32[4,376], index: 2, kind: output, shape index: {0}]   ;;  %s204_s3 = inlined_call_operand.hbm [shape: f32[4,344], index: 3, kind: output, shape index: {1}, may-alias: {0,3}]  }
   0x1   :  { %10 = vsyncpa [#allocation4], 0 }
   0x2   :  { %11 = vsyncpa [#allocation7], 0  ;;  %s162_s12 = smov [#allocation2]  }
   0x3   :  { %s18_s13 = sshll.u32 %s162_s12, 4  ;;  %s19_s13 = int_to_ptr.vmem [resolvable:$true] %s18_s13 }
   0x4   :  { %s104_s14 = scalar_lea.vmem %s19_s13, 192  ;;  %p109_p1 = scmp.lt.s32.totalorder %s19_s13, %s19_s13 }
   0x5   :  { %p105_p0 = scmp.ne.s32.totalorder %s19_s13, %s104_s14  ;;  %p110_p2 = scmp.lt.s32.totalorder %s104_s14, %s104_s14 }
   0x7   :  { %p111_p3 = por %p110_p2, %p109_p1 }
   0x9   :  { %p112_p4 = pnand %p111_p3, %p105_p0 }
   0xb   :  { %115 = shalt.err (!%p112_p4)
}
   0xc   :  { %21 = dma.hbm_to_vmem [thread:$0]  %s201_s0, 192, %s19_s13, [#allocation3]  }
   0xd   :  { %156 = dma.done.wait [#allocation3], 192  }
   0xe   :  { %157 = vsyncadd [#allocation3], 4294967104  ;;  %vm31_vm0 = vcmask 715776   ;;  %v27_v0 = vld [vmem:[#allocation2] sm:$0xff]  ;;  %v28_v2 = vld [vmem:[#allocation2 + $0x8] sm:$0xf] }
   0xf   :  { %v29_v1 = vld [vmem:[%s202_s1] sm:$0xf]  ;;  %s163_s19 = smov 96   ;;  %30 = vst [vmem:[#allocation5] sm:$0xff] %v27_v0  ;;  %s164_s20 = smov 88   ;;  %vm37_vm1 = vcmask 978624  }
  0x10   :  { %41 = vrot.lane.b32.xlu0 %v27_v0, %s163_s19  ;;  %34 = vrot.lane.b32.xlu1 %v29_v1, %s164_s20  ;;  %32 = vst.msk [vmem:[#allocation5 + $0x8] sm:$0xf] %vm31_vm0, %v28_v2  ;;  %s165_s21 = smov 56   ;;  %s166_s22 = smov [#allocation5]   ;;  %vm54_vm2 = vcmask 453632  }
  0x11   :  { %s67_s0 = sshll.u32 %s166_s22, 4  ;;  %s68_s0 = int_to_ptr.vmem [resolvable:$true] %s67_s0 }
  0x12   :  { %s116_s23 = scalar_lea.vmem %s68_s0, 192  ;;  %p121_p6 = scmp.lt.s32.totalorder %s68_s0, %s68_s0 }
  0x13   :  { %p117_p5 = scmp.ne.s32.totalorder %s68_s0, %s116_s23  ;;  %p122_p7 = scmp.lt.s32.totalorder %s116_s23, %s116_s23 }
  0x14   :  { %43 = vrot.lane.b32.xlu0 %v28_v2, %s163_s19  ;;  %56 = vrot.lane.b32.xlu1 %v29_v1, %s165_s21 }
  0x15   :  { %p123_p8 = por %p122_p7, %p121_p6 }
  0x17   :  { %p124_p9 = pnand %p123_p8, %p117_p5 }
  0x82   :  { %v42_v3 = vpop.permute.xlu0 %41  ;;  %v35_v4 = vpop.permute.xlu1 %34 }
  0x83   :  { %38 = vst.msk [vmem:[#allocation5 + $0x8] sm:$0xf] %vm37_vm1, %v35_v4 }
  0x84   :  { %127 = shalt.err (!%p124_p9)
}
  0x85   :  { %70 = dma.vmem_to_hbm [thread:$0]  %s68_s0, 192, %s203_s2, [#allocation4]   ;;  %vm59_vm3 = vcmask 716224   ;;  %vm47_vm4 = vcmask 1043456   ;;  %v45_v7 = vrot.slane %v42_v3, 4  ;;  %vm49_vm5 = vcmask 785408  }
  0x86   :  { %v44_v5 = vpop.permute.xlu0 %43  ;;  %v57_v6 = vpop.permute.xlu1 %56  ;;  %s167_s25 = smov [#allocation6]  }
  0x87   :  { %s77_s26 = sshll.u32 %s167_s25, 4  ;;  %v46_v8 = vrot.slane %v44_v5, 4  ;;  %55 = vst.msk [vmem:[#allocation6 + $0x8] sm:$0xf] %vm54_vm2, %v44_v5  ;;  %s78_s26 = int_to_ptr.vmem [resolvable:$true] %s77_s26 }
  0x88   :  { %60 = vst.msk [vmem:[#allocation6 + $0x8] sm:$0xf] %vm59_vm3, %v57_v6  ;;  %s136_s27 = scalar_lea.vmem %s78_s26, 192  ;;  %p141_p11 = scmp.lt.s32.totalorder %s78_s26, %s78_s26 }
  0x89   :  { %v48_v9 = vsel %vm47_vm4, %v45_v7, %v46_v8  ;;  %p137_p10 = scmp.ne.s32.totalorder %s78_s26, %s136_s27  ;;  %p142_p12 = scmp.lt.s32.totalorder %s136_s27, %s136_s27 }
  0x8a   :  { %v50_v10 = vsel %vm49_vm5, %v42_v3, %v48_v9 }
  0x8b   :  { %53 = vst [vmem:[#allocation6] sm:$0xff] %v50_v10  ;;  %p143_p13 = por %p142_p12, %p141_p11 }
  0x8d   :  { %p144_p0 = pnand %p143_p13, %p137_p10 }
  0x8f   :  { %147 = shalt.err (!%p144_p0)
}
  0x90   :  { %80 = dma.vmem_to_hbm [thread:$0]  %s78_s26, 192, %s204_s3, [#allocation7]  }
  0x91   :  { %158 = dma.done.wait [#allocation4], 192  }
  0x92   :  { %159 = vsyncadd [#allocation4], 4294967104 }
  0x93   :  { %160 = dma.done.wait [#allocation7], 192  }
  0x94   :  { %161 = vsyncadd [#allocation7], 4294967104 }
  0x95   :  { %87 = vsyncpa [#allocation3], 1 }
  0x96   :  { %88 = vsyncpa [#allocation4], 1 }
  0x97   :  { %89 = vsyncpa [#allocation7], 1 }

</bundles_post_ra>
